<compile_context>
chip_gen: v7x
topology: tpu7x:2x2x1
jax: 0.10.0
libtpu: 0.0.40
codegen_flags: <defaults>
</compile_context>

<pallas_src>
import jax
import jax.numpy as jnp
from jax.experimental import pallas as pl
from jax.experimental.pallas import tpu as pltpu


def _upsample_kernel(x_ref, rh_ref, rw_ref, o_ref):
    tc = x_ref.shape[0]
    x = x_ref[...].astype(jnp.float32)                                  # (TC, H, W)
    rh = jnp.broadcast_to(rh_ref[...][None], (tc,) + rh_ref.shape)      # (TC, H_out, H)
    rw = jnp.broadcast_to(rw_ref[...][None], (tc,) + rw_ref.shape)      # (TC, W, W_out)
    # H replication (rows): (TC, H_out, H) @ (TC, H, W) -> (TC, H_out, W)
    t = jnp.einsum("bph,bhw->bpw", rh, x, preferred_element_type=jnp.float32)
    # W replication (cols): (TC, H_out, W) @ (TC, W, W_out) -> (TC, H_out, W_out)
    o = jnp.einsum("bpw,bwz->bpz", t, rw, preferred_element_type=jnp.float32)
    o_ref[...] = o.astype(o_ref.dtype)


def _rep_rows(n, s, dtype):
    """One-hot (n*s, n): (R @ x) repeats each row of x s times."""
    return (jnp.arange(n * s)[:, None] // s == jnp.arange(n)[None, :]).astype(dtype)


def _rep_cols(n, s, dtype):
    """One-hot (n, n*s): (x @ R) repeats each column of x s times."""
    return (jnp.arange(n)[:, None] == jnp.arange(n * s)[None, :] // s).astype(dtype)


def upsample_pallas(x_nchw, scale_factor=2, mode="nearest"):
    if mode != "nearest":
        raise NotImplementedError("only mode='nearest' is supported")
    s = int(scale_factor)
    assert s == scale_factor and s >= 1, "integer scale_factor only"

    b, c, h, w = x_nchw.shape
    h_out, w_out = h * s, w * s
    rows = b * c

    x3 = x_nchw.reshape(rows, h, w)                       # free reshape (row-major)
    rh = _rep_rows(h, s, jnp.float32)                     # (h_out, h)   tiny one-hot
    rw = _rep_cols(w, s, jnp.float32)                     # (w, w_out)   tiny one-hot

    # Channel-row block: all rows in one fat step for small B*C; for large B*C
    # split into blocks so VMEM stays comfortable and the "parallel" grid axis
    # can spread across TensorCores.
    tr = rows
    if rows > 256:
        tr = 256
        while rows % tr:
            tr //= 2
    grid = (rows // tr,)

    out3 = pl.pallas_call(
        _upsample_kernel,
        out_shape=jax.ShapeDtypeStruct((rows, h_out, w_out), x_nchw.dtype),
        grid_spec=pltpu.PrefetchScalarGridSpec(
            num_scalar_prefetch=0,
            grid=grid,
            in_specs=[
                pl.BlockSpec((tr, h, w), lambda i: (i, 0, 0)),      # x block
                pl.BlockSpec((h_out, h), lambda i: (0, 0)),         # row-replication
                pl.BlockSpec((w, w_out), lambda i: (0, 0)),         # col-replication
            ],
            out_specs=pl.BlockSpec((tr, h_out, w_out), lambda i: (i, 0, 0)),
        ),
        compiler_params=pltpu.CompilerParams(
            dimension_semantics=("parallel",)),
    )(x3, rh, rw)
    return out3.reshape(b, c, h_out, w_out)


def upsample_reference(x, scale_factor=2):
    """Pure-JAX replica of F.interpolate(mode='nearest', integer scale)."""
    s = int(scale_factor)
    return jnp.repeat(jnp.repeat(x, s, axis=2), s, axis=3)


if __name__ == "__main__":
    key = jax.random.PRNGKey(0)
    x = jax.random.normal(key, (2, 4, 16, 16), jnp.float32)

    y = upsample_pallas(x, scale_factor=2, mode="nearest")
    y = jax.block_until_ready(y)

    y_ref = upsample_reference(x, 2)
    assert y.shape == (2, 4, 32, 32)
    assert jnp.allclose(y, y_ref, atol=1e-6, rtol=1e-6), "mismatch vs reference"

    print("KERNEL_OK")
</pallas_src>

<mosaic_0001>
module attributes {stable_mosaic.version = 11 : i64} {
  func.func @_upsample_kernel(%arg0: i32, %arg1: memref<8x16x16xf32, #tpu.memory_space<vmem>>, %arg2: memref<32x16xf32, #tpu.memory_space<vmem>>, %arg3: memref<16x32xf32, #tpu.memory_space<vmem>>, %arg4: memref<8x32x32xf32, #tpu.memory_space<vmem>>) attributes {dimension_semantics = [#tpu.dimension_semantics<parallel>], iteration_bounds = array<i64: 1>, scalar_prefetch = 0 : i64, scratch_operands = 0 : i64, tpu.core_type = #tpu.core_type<tc>, window_params = [{transform_indices = @transform_0, window_bounds = array<i64: 8, 16, 16>}, {pipeline_mode = #tpu.pipeline_mode<synchronous>, transform_indices = @transform_1, window_bounds = array<i64: 32, 16>}, {pipeline_mode = #tpu.pipeline_mode<synchronous>, transform_indices = @transform_2, window_bounds = array<i64: 16, 32>}, {transform_indices = @transform_3, window_bounds = array<i64: 8, 32, 32>}]} {
    %c0 = arith.constant 0 : index
    %c0_0 = arith.constant 0 : index
    %c0_1 = arith.constant 0 : index
    %0 = vector.load %arg1[%c0, %c0_0, %c0_1] : memref<8x16x16xf32, #tpu.memory_space<vmem>>, vector<8x16x16xf32>
    %c0_2 = arith.constant 0 : index
    %c0_3 = arith.constant 0 : index
    %1 = vector.load %arg2[%c0_2, %c0_3] : memref<32x16xf32, #tpu.memory_space<vmem>>, vector<32x16xf32>
    %2 = vector.shape_cast %1 : vector<32x16xf32> to vector<1x32x16xf32>
    %3 = vector.shape_cast %2 : vector<1x32x16xf32> to vector<1x32x16xf32>
    %4 = vector.broadcast %3 : vector<1x32x16xf32> to vector<8x32x16xf32>
    %c0_4 = arith.constant 0 : index
    %c0_5 = arith.constant 0 : index
    %5 = vector.load %arg3[%c0_4, %c0_5] : memref<16x32xf32, #tpu.memory_space<vmem>>, vector<16x32xf32>
    %6 = vector.shape_cast %5 : vector<16x32xf32> to vector<1x16x32xf32>
    %7 = vector.shape_cast %6 : vector<1x16x32xf32> to vector<1x16x32xf32>
    %8 = vector.broadcast %7 : vector<1x16x32xf32> to vector<8x16x32xf32>
    "tpu.trace_start"() <{level = 10 : i32, message = "bph,bhw->bpw"}> : () -> ()
    %cst = arith.constant dense<0.000000e+00> : vector<8x32x16xf32>
    %9 = tpu.matmul %4, %0, %cst {dimension_numbers = #tpu.dot_dimension_numbers<[2], [1], [1], [2], [0, 0, 0, 1, 1, 2], [0], [0]>} : vector<8x32x16xf32>, vector<8x16x16xf32>, vector<8x32x16xf32> -> vector<8x32x16xf32>
    "tpu.trace_stop"() : () -> ()
    "tpu.trace_start"() <{level = 10 : i32, message = "bpw,bwz->bpz"}> : () -> ()
    %cst_6 = arith.constant dense<0.000000e+00> : vector<8x32x32xf32>
    %10 = tpu.matmul %9, %8, %cst_6 {dimension_numbers = #tpu.dot_dimension_numbers<[2], [1], [1], [2], [0, 0, 0, 1, 1, 2], [0], [0]>} : vector<8x32x16xf32>, vector<8x16x32xf32>, vector<8x32x32xf32> -> vector<8x32x32xf32>
    "tpu.trace_stop"() : () -> ()
    %c0_7 = arith.constant 0 : index
    %c0_8 = arith.constant 0 : index
    %c0_9 = arith.constant 0 : index
    %11 = vector.load %arg4[%c0_7, %c0_8, %c0_9] : memref<8x32x32xf32, #tpu.memory_space<vmem>>, vector<8x32x32xf32>
    tpu.vector_store %arg4[%c0_7, %c0_8, %c0_9], %10 {strides = array<i32>} : memref<8x32x32xf32, #tpu.memory_space<vmem>>, vector<8x32x32xf32>,
    return
  }
  func.func @transform_0(%arg0: i32) -> (i32, i32, i32) {
    %c0_i32 = arith.constant 0 : i32
    %c0_i32_0 = arith.constant 0 : i32
    %c0_i32_1 = arith.constant 0 : i32
    return %arg0, %c0_i32, %c0_i32_0 : i32, i32, i32
  }
  func.func @transform_1(%arg0: i32) -> (i32, i32) {
    %c0_i32 = arith.constant 0 : i32
    %c0_i32_0 = arith.constant 0 : i32
    %c0_i32_1 = arith.constant 0 : i32
    return %c0_i32, %c0_i32_0 : i32, i32
  }
  func.func @transform_2(%arg0: i32) -> (i32, i32) {
    %c0_i32 = arith.constant 0 : i32
    %c0_i32_0 = arith.constant 0 : i32
    %c0_i32_1 = arith.constant 0 : i32
    return %c0_i32, %c0_i32_0 : i32, i32
  }
  func.func @transform_3(%arg0: i32) -> (i32, i32, i32) {
    %c0_i32 = arith.constant 0 : i32
    %c0_i32_0 = arith.constant 0 : i32
    %c0_i32_1 = arith.constant 0 : i32
    return %arg0, %c0_i32, %c0_i32_0 : i32, i32, i32
  }
}

</mosaic_0001>

<bundles_post_ra>
// kernel: tpu_custom_call.1
= control target key start
LH: loop header
LB: loop body
LE: loop exit
PB: predicated region body
PF: predicated region fallthrough
CT: control target
= control target key end

     0   :  { %8 = vsyncpa [#allocation3], 0  ;;  %s2212_s0 = inlined_call_operand.hbm [shape: f32[8,16,16], index: 0, kind: input, shape index: {}]   ;;  %s2213_s1 = inlined_call_operand.vmem [shape: f32[32,16], index: 1, kind: input, shape index: {}]   ;;  %s2214_s2 = inlined_call_operand.vmem [shape: f32[16,32], index: 2, kind: input, shape index: {}]   ;;  %s2215_s3 = inlined_call_operand.hbm [shape: f32[8,32,32], index: 3, kind: output, shape index: {}]  }
   0x1   :  { %9 = vsyncpa [#allocation4], 0  ;;  %s2006_s12 = smov [#allocation2]   ;;  %s1958_s16 = scalar_lea.hbm %s2212_s0, 2048 }
   0x2   :  { %s15_s13 = sshll.u32 %s2006_s12, 4  ;;  %p1959_p0 = scmp.ne.s32.totalorder %s2212_s0, %s1958_s16  ;;  %s16_s13 = int_to_ptr.vmem [resolvable:$true] %s15_s13 }
   0x3   :  { %p1962_p1 = scmp.lt.u32.totalorder %s1958_s16, %s2212_s0 }
   0x5   :  { %p1964_p2 = pnand %p1962_p1, %p1959_p0 }
   0x7   :  { %1967 = shalt.err (!%p1964_p2)
}
   0x8   :  { %s1968_s21 = scalar_lea.vmem %s16_s13, 2048  ;;  %p1973_p4 = scmp.lt.s32.totalorder %s16_s13, %s16_s13 }
   0x9   :  { %p1969_p3 = scmp.ne.s32.totalorder %s16_s13, %s1968_s21  ;;  %p1974_p5 = scmp.lt.s32.totalorder %s1968_s21, %s1968_s21 }
   0xb   :  { %p1975_p6 = por %p1974_p5, %p1973_p4 }
   0xd   :  { %p1976_p7 = pnand %p1975_p6, %p1969_p3 }
   0xf   :  { %1979 = shalt.err (!%p1976_p7)
}
  0x10   :  { %s2007_s22 = smov 128   ;;  %s2008_s23 = smov 8  }
  0x11   :  { %21 = dma.hbm_to_vmem [thread:$0]  %s2212_s0, 2048, %s16_s13, [#allocation3], %s2007_s22, %s2007_s22, %s2008_s23  }
  0x12   :  { %2002 = dma.done.wait [#allocation3], 2048  }
  0x13   :  { %2003 = vsyncadd [#allocation3], 4294965248  ;;  %vm51_vm0 = vcmask 130048   ;;  %v29_v0 = vld [vmem:[#allocation2] sm:$0xff]  ;;  %v30_v1 = vld [vmem:[#allocation2 + $0x8] sm:$0xff]  ;;  %vm1520_vm1 = vcmask 261120  }
  0x14   :  { %v31_v2 = vld [vmem:[#allocation2 + $0x10] sm:$0xff]  ;;  %v1890_v3 = vpack.c.bf16 %v30_v1, %v29_v0  ;;  %v32_v4 = vld [vmem:[#allocation2 + $0x18] sm:$0xff]  ;;  %v2048_v5 = vld [vmem:[%s2213_s1] sm:$0xff] }
  0x15   :  { %v1894_v6 = vpack.c.bf16 %v32_v4, %v31_v2  ;;  %1734 = vmatprep.mubr.msk.f32.mxu0 %vm51_vm0, %v2048_v5  ;;  %1744 = vmatprep.mubr.msk.f32.mxu1 %vm51_vm0, %v2048_v5  ;;  %v33_v7 = vld [vmem:[#allocation2 + $0x20] sm:$0xff]  ;;  %v34_v8 = vld [vmem:[#allocation2 + $0x28] sm:$0xff]  ;;  %v35_v9 = vld [vmem:[#allocation2 + $0x30] sm:$0xff] }
  0x16   :  { %1891 = vmatprep.subr.bf16.mxu0 %v1890_v3  ;;  %v2057_v10 = vld [vmem:[%s2213_s1 + $0x8] sm:$0xff]  ;;  %v1898_v11 = vpack.c.bf16 %v34_v8, %v33_v7  ;;  %v36_v12 = vld [vmem:[#allocation2 + $0x38] sm:$0xff]  ;;  %v37_v14 = vld [vmem:[#allocation2 + $0x40] sm:$0xff] }
  0x17   :  { %1895 = vmatprep.subr.bf16.mxu1 %v1894_v6  ;;  %1893 = vmatpush3.bf16.msra.mxu0 %v1890_v3  ;;  %v1902_v13 = vpack.c.bf16 %v36_v12, %v35_v9  ;;  %v38_v15 = vld [vmem:[#allocation2 + $0x48] sm:$0xff]  ;;  %v39_v16 = vld [vmem:[#allocation2 + $0x50] sm:$0xff]  ;;  %v40_v17 = vld [vmem:[#allocation2 + $0x58] sm:$0xff] }
  0x18   :  { %1897 = vmatpush3.bf16.msra.mxu1 %v1894_v6  ;;  %1899 = vmatprep.subr.bf16.mxu0 %v1898_v11  ;;  %v47_v18 = vld [vmem:[%s2213_s1 + $0x10] sm:$0xff]  ;;  %v1906_v19 = vpack.c.bf16 %v38_v15, %v37_v14  ;;  %v1910_v20 = vpack.c.bf16 %v40_v17, %v39_v16  ;;  %v48_v21 = vld [vmem:[%s2213_s1 + $0x18] sm:$0xff]  ;;  %v41_v22 = vld [vmem:[#allocation2 + $0x60] sm:$0xff] }
  0x19   :  { %1903 = vmatprep.subr.bf16.mxu1 %v1902_v13  ;;  %v42_v23 = vld [vmem:[#allocation2 + $0x68] sm:$0xff]  ;;  %v43_v24 = vld [vmem:[#allocation2 + $0x70] sm:$0xff]  ;;  %v44_v25 = vld [vmem:[#allocation2 + $0x78] sm:$0xff] }
  0x1a   :  { %1735 = vmatmul.mubr.msk.f32.vlgmr.msra.gmra.mrb[0].mxu0 %vm51_vm0, %v2057_v10  ;;  %v1914_v26 = vpack.c.bf16 %v42_v23, %v41_v22  ;;  %v1918_v27 = vpack.c.bf16 %v44_v25, %v43_v24  ;;  %v49_v28 = vld [vmem:[%s2214_s2] sm:$0xff]  ;;  %v50_v29 = vld [vmem:[%s2214_s2 + $0x8] sm:$0xff]  ;;  %s2009_s2 = smov [#allocation5]  }
  0x1b   :  { %1745 = vmatmul.mubr.msk.f32.vlgmr.msra.gmra.mrb[0].mxu1 %vm51_vm0, %v2057_v10  ;;  %1901 = vmatpush3.bf16.msra.mxu0 %v1898_v11  ;;  %v2095_v30 = vpack.c.bf16 %v50_v29, %v49_v28  ;;  %s1558_s9 = sshll.u32 %s2009_s2, 4  ;;  %s1559_s9 = int_to_ptr.vmem [resolvable:$true] %s1558_s9 }
  0x1c   :  { %1905 = vmatpush3.bf16.msra.mxu1 %v1902_v13  ;;  %1737 = vmatprep.mubr.msk.f32.mxu0 %vm51_vm0, %v47_v18  ;;  %s1980_s10 = scalar_lea.vmem %s1559_s9, 4096  ;;  %p1985_p9 = scmp.lt.s32.totalorder %s1559_s9, %s1559_s9 }
  0x1d   :  { %1747 = vmatprep.mubr.msk.f32.mxu1 %vm51_vm0, %v47_v18  ;;  %1907 = vmatprep.subr.bf16.mxu0 %v1906_v19  ;;  %p1981_p8 = scmp.ne.s32.totalorder %s1559_s9, %s1980_s10  ;;  %p1986_p10 = scmp.lt.s32.totalorder %s1980_s10, %s1980_s10 }
  0x1e   :  { %1738 = vmatmul.mubr.msk.f32.gmra.mrb[2].mxu0 %vm51_vm0, %v48_v21  ;;  %1911 = vmatprep.subr.bf16.mxu1 %v1910_v20 }
  0x1f   :  { %1748 = vmatmul.mubr.msk.f32.gmra.mrb[2].mxu1 %vm51_vm0, %v48_v21  ;;  %1754 = vmatprep.mubr.msk.f32.mxu0 %vm51_vm0, %v2048_v5  ;;  %p1987_p11 = por %p1986_p10, %p1985_p9 }
  0x20   :  { %1764 = vmatprep.mubr.msk.f32.mxu1 %vm51_vm0, %v2048_v5 }
  0x21   :  { %p1988_p12 = pnand %p1987_p11, %p1981_p8 }
  0x22   :  { %1755 = vmatmul.mubr.msk.f32.vlgmr.msra.gmra.mrb[4].mxu0 %vm51_vm0, %v2057_v10 }
  0x23   :  { %1765 = vmatmul.mubr.msk.f32.vlgmr.msra.gmra.mrb[4].mxu1 %vm51_vm0, %v2057_v10  ;;  %1909 = vmatpush3.bf16.msra.mxu0 %v1906_v19 }
  0x24   :  { %1913 = vmatpush3.bf16.msra.mxu1 %v1910_v20  ;;  %1757 = vmatprep.mubr.msk.f32.mxu0 %vm51_vm0, %v47_v18 }
  0x25   :  { %1767 = vmatprep.mubr.msk.f32.mxu1 %vm51_vm0, %v47_v18  ;;  %1915 = vmatprep.subr.bf16.mxu0 %v1914_v26 }
  0x26   :  { %1758 = vmatmul.mubr.msk.f32.gmra.mrb[6].mxu0 %vm51_vm0, %v48_v21  ;;  %1919 = vmatprep.subr.bf16.mxu1 %v1918_v27 }
  0x27   :  { %1768 = vmatmul.mubr.msk.f32.gmra.mrb[6].mxu1 %vm51_vm0, %v48_v21  ;;  %1774 = vmatprep.mubr.msk.f32.mxu0 %vm51_vm0, %v2048_v5 }
  0x28   :  { %1784 = vmatprep.mubr.msk.f32.mxu1 %vm51_vm0, %v2048_v5 }
  0x2a   :  { %1775 = vmatmul.mubr.msk.f32.vlgmr.msra.gmra.mrb[8].mxu0 %vm51_vm0, %v2057_v10 }
  0x2b   :  { %1785 = vmatmul.mubr.msk.f32.vlgmr.msra.gmra.mrb[8].mxu1 %vm51_vm0, %v2057_v10  ;;  %1917 = vmatpush3.bf16.msra.mxu0 %v1914_v26 }
  0x2c   :  { %1921 = vmatpush3.bf16.msra.mxu1 %v1918_v27  ;;  %1777 = vmatprep.mubr.msk.f32.mxu0 %vm51_vm0, %v47_v18 }
  0x2d   :  { %1787 = vmatprep.mubr.msk.f32.mxu1 %vm51_vm0, %v47_v18  ;;  %1923 = vmatprep.subr.bf16.mxu0 %v2095_v30 }
  0x2e   :  { %1778 = vmatmul.mubr.msk.f32.gmra.mrb[10].mxu0 %vm51_vm0, %v48_v21  ;;  %1927 = vmatprep.subr.bf16.mxu1 %v2095_v30 }
  0x2f   :  { %1788 = vmatmul.mubr.msk.f32.gmra.mrb[10].mxu1 %vm51_vm0, %v48_v21  ;;  %1794 = vmatprep.mubr.msk.f32.mxu0 %vm51_vm0, %v2048_v5 }
  0x30   :  { %1804 = vmatprep.mubr.msk.f32.mxu1 %vm51_vm0, %v2048_v5 }
  0x32   :  { %1795 = vmatmul.mubr.msk.f32.vlgmr.msra.gmra.mrb[12].mxu0 %vm51_vm0, %v2057_v10 }
  0x33   :  { %1805 = vmatmul.mubr.msk.f32.vlgmr.msra.gmra.mrb[12].mxu1 %vm51_vm0, %v2057_v10  ;;  %1797 = vmatprep.mubr.msk.f32.mxu0 %vm51_vm0, %v47_v18 }
  0x34   :  { %1807 = vmatprep.mubr.msk.f32.mxu1 %vm51_vm0, %v47_v18  ;;  %1925 = vmatpush3.bf16.msra.mxu0 %v2095_v30 }
  0x35   :  { %1929 = vmatpush3.bf16.msra.mxu1 %v2095_v30  ;;  %1931 = vmatprep.subr.bf16.mxu0 %v2095_v30 }
  0x36   :  { %1798 = vmatmul.mubr.msk.f32.gmra.mrb[14].mxu0 %vm51_vm0, %v48_v21  ;;  %1935 = vmatprep.subr.bf16.mxu1 %v2095_v30 }
  0x37   :  { %1808 = vmatmul.mubr.msk.f32.gmra.mrb[14].mxu1 %vm51_vm0, %v48_v21 }
  0xed   :  { %v1736_v31 = vpop.f32.mrb[0].mxu0 }
  0xee   :  { %v1746_v32 = vpop.f32.mrb[0].mxu1  ;;  %v130_v33 = vpop.f32.mrb[1].mxu0 }
  0xef   :  { %v215_v34 = vpop.f32.mrb[1].mxu1  ;;  %1814 = vmatprep.mubr.msk.f32.mxu0 %vm51_vm0, %v130_v33 }
  0xf0   :  { %1824 = vmatprep.mubr.msk.f32.mxu1 %vm51_vm0, %v215_v34  ;;  %1815 = vmatmul.mubr.msk.f32.vlgmr.msra.gmra.mrb[16].mxu0 %vm51_vm0, %v1736_v31 }
  0xf1   :  { %1825 = vmatmul.mubr.msk.f32.vlgmr.msra.gmra.mrb[16].mxu1 %vm51_vm0, %v1746_v32  ;;  %v1739_v35 = vpop.f32.mrb[2].mxu0  ;;  %1933 = vmatpush3.bf16.msra.mxu0 %v2095_v30 }
  0xf2   :  { %v1749_v36 = vpop.f32.mrb[2].mxu1  ;;  %1937 = vmatpush3.bf16.msra.mxu1 %v2095_v30  ;;  %v140_v37 = vpop.f32.mrb[3].mxu0  ;;  %1939 = vmatprep.subr.bf16.mxu0 %v2095_v30 }
  0xf3   :  { %v225_v38 = vpop.f32.mrb[3].mxu1  ;;  %1817 = vmatprep.mubr.msk.f32.mxu0 %vm51_vm0, %v140_v37  ;;  %1943 = vmatprep.subr.bf16.mxu1 %v2095_v30 }
  0xf4   :  { %1827 = vmatprep.mubr.msk.f32.mxu1 %vm51_vm0, %v225_v38  ;;  %1818 = vmatmul.mubr.msk.f32.gmra.mrb[18].mxu0 %vm51_vm0, %v1739_v35 }
  0xf5   :  { %1828 = vmatmul.mubr.msk.f32.gmra.mrb[18].mxu1 %vm51_vm0, %v1749_v36  ;;  %v1756_v39 = vpop.f32.mrb[4].mxu0 }
  0xf6   :  { %v1766_v40 = vpop.f32.mrb[4].mxu1  ;;  %v300_v41 = vpop.f32.mrb[5].mxu0 }
  0xf7   :  { %v385_v42 = vpop.f32.mrb[5].mxu1  ;;  %1834 = vmatprep.mubr.msk.f32.mxu0 %vm51_vm0, %v300_v41 }
  0xf8   :  { %1844 = vmatprep.mubr.msk.f32.mxu1 %vm51_vm0, %v385_v42  ;;  %1835 = vmatmul.mubr.msk.f32.vlgmr.msra.gmra.mrb[20].mxu0 %vm51_vm0, %v1756_v39 }
  0xf9   :  { %1845 = vmatmul.mubr.msk.f32.vlgmr.msra.gmra.mrb[20].mxu1 %vm51_vm0, %v1766_v40  ;;  %v1759_v43 = vpop.f32.mrb[6].mxu0  ;;  %1941 = vmatpush3.bf16.msra.mxu0 %v2095_v30 }
  0xfa   :  { %v1769_v44 = vpop.f32.mrb[6].mxu1  ;;  %1945 = vmatpush3.bf16.msra.mxu1 %v2095_v30  ;;  %v310_v45 = vpop.f32.mrb[7].mxu0  ;;  %1947 = vmatprep.subr.bf16.mxu0 %v2095_v30 }
  0xfb   :  { %v395_v46 = vpop.f32.mrb[7].mxu1  ;;  %1837 = vmatprep.mubr.msk.f32.mxu0 %vm51_vm0, %v310_v45  ;;  %1951 = vmatprep.subr.bf16.mxu1 %v2095_v30 }
  0xfc   :  { %1847 = vmatprep.mubr.msk.f32.mxu1 %vm51_vm0, %v395_v46  ;;  %1838 = vmatmul.mubr.msk.f32.gmra.mrb[22].mxu0 %vm51_vm0, %v1759_v43 }
  0xfd   :  { %1848 = vmatmul.mubr.msk.f32.gmra.mrb[22].mxu1 %vm51_vm0, %v1769_v44  ;;  %v1776_v47 = vpop.f32.mrb[8].mxu0 }
  0xfe   :  { %v1786_v48 = vpop.f32.mrb[8].mxu1  ;;  %v470_v49 = vpop.f32.mrb[9].mxu0 }
  0xff   :  { %v555_v50 = vpop.f32.mrb[9].mxu1  ;;  %1854 = vmatprep.mubr.msk.f32.mxu0 %vm51_vm0, %v470_v49 }
 0x100   :  { %1864 = vmatprep.mubr.msk.f32.mxu1 %vm51_vm0, %v555_v50  ;;  %1855 = vmatmul.mubr.msk.f32.vlgmr.msra.gmra.mrb[24].mxu0 %vm51_vm0, %v1776_v47 }
 0x101   :  { %1865 = vmatmul.mubr.msk.f32.vlgmr.msra.gmra.mrb[24].mxu1 %vm51_vm0, %v1786_v48  ;;  %v1779_v51 = vpop.f32.mrb[10].mxu0  ;;  %1949 = vmatpush3.bf16.msra.mxu0 %v2095_v30 }
 0x102   :  { %v1789_v52 = vpop.f32.mrb[10].mxu1  ;;  %1953 = vmatpush3.bf16.msra.mxu1 %v2095_v30  ;;  %v480_v53 = vpop.f32.mrb[11].mxu0 }
 0x103   :  { %v565_v54 = vpop.f32.mrb[11].mxu1  ;;  %1857 = vmatprep.mubr.msk.f32.mxu0 %vm51_vm0, %v480_v53 }
 0x104   :  { %1867 = vmatprep.mubr.msk.f32.mxu1 %vm51_vm0, %v565_v54  ;;  %1858 = vmatmul.mubr.msk.f32.gmra.mrb[26].mxu0 %vm51_vm0, %v1779_v51 }
 0x105   :  { %1868 = vmatmul.mubr.msk.f32.gmra.mrb[26].mxu1 %vm51_vm0, %v1789_v52  ;;  %v1796_v55 = vpop.f32.mrb[12].mxu0 }
 0x106   :  { %v1806_v56 = vpop.f32.mrb[12].mxu1  ;;  %v640_v57 = vpop.f32.mrb[13].mxu0 }
 0x107   :  { %v725_v58 = vpop.f32.mrb[13].mxu1  ;;  %1874 = vmatprep.mubr.msk.f32.mxu0 %vm51_vm0, %v640_v57 }
 0x108   :  { %1884 = vmatprep.mubr.msk.f32.mxu1 %vm51_vm0, %v725_v58  ;;  %1875 = vmatmul.mubr.msk.f32.vlgmr.msra.gmra.mrb[28].mxu0 %vm51_vm0, %v1796_v55 }
 0x109   :  { %1885 = vmatmul.mubr.msk.f32.vlgmr.msra.gmra.mrb[28].mxu1 %vm51_vm0, %v1806_v56  ;;  %v1799_v59 = vpop.f32.mrb[14].mxu0 }
 0x10a   :  { %v1809_v60 = vpop.f32.mrb[14].mxu1  ;;  %v650_v61 = vpop.f32.mrb[15].mxu0 }
 0x10b   :  { %v735_v62 = vpop.f32.mrb[15].mxu1  ;;  %1877 = vmatprep.mubr.msk.f32.mxu0 %vm51_vm0, %v650_v61 }
 0x10c   :  { %1887 = vmatprep.mubr.msk.f32.mxu1 %vm51_vm0, %v735_v62  ;;  %1878 = vmatmul.mubr.msk.f32.gmra.mrb[30].mxu0 %vm51_vm0, %v1799_v59 }
 0x10d   :  { %1888 = vmatmul.mubr.msk.f32.gmra.mrb[30].mxu1 %vm51_vm0, %v1809_v60 }
 0x1c3   :  { %v1816_v63 = vpop.f32.mrb[16].mxu0 }
 0x1c4   :  { %1522 = vst.msk [vmem:[#allocation5 + $0x8] sm:$0xff] %vm1520_vm1, %v1816_v63  ;;  %v1826_v0 = vpop.f32.mrb[16].mxu1  ;;  %v822_v1 = vpop.f32.mrb[17].mxu0 }
 0x1c5   :  { %1526 = vst.msk [vmem:[#allocation5 + $0x28] sm:$0xff] %vm1520_vm1, %v1826_v0  ;;  %1521 = vst.msk [vmem:[#allocation5] sm:$0xff] %vm1520_vm1, %v822_v1  ;;  %v919_v2 = vpop.f32.mrb[17].mxu1 }
 0x1c6   :  { %1525 = vst.msk [vmem:[#allocation5 + $0x20] sm:$0xff] %vm1520_vm1, %v919_v2 }
 0x1c7   :  { %v1819_v3 = vpop.f32.mrb[18].mxu0 }
 0x1c8   :  { %1524 = vst.msk [vmem:[#allocation5 + $0x18] sm:$0xff] %vm1520_vm1, %v1819_v3  ;;  %v1829_v4 = vpop.f32.mrb[18].mxu1  ;;  %v832_v5 = vpop.f32.mrb[19].mxu0 }
 0x1c9   :  { %1528 = vst.msk [vmem:[#allocation5 + $0x38] sm:$0xff] %vm1520_vm1, %v1829_v4  ;;  %1523 = vst.msk [vmem:[#allocation5 + $0x10] sm:$0xff] %vm1520_vm1, %v832_v5  ;;  %v929_v6 = vpop.f32.mrb[19].mxu1 }
 0x1ca   :  { %1527 = vst.msk [vmem:[#allocation5 + $0x30] sm:$0xff] %vm1520_vm1, %v929_v6 }
 0x1cb   :  { %v1836_v7 = vpop.f32.mrb[20].mxu0 }
 0x1cc   :  { %1530 = vst.msk [vmem:[#allocation5 + $0x48] sm:$0xff] %vm1520_vm1, %v1836_v7  ;;  %v1846_v8 = vpop.f32.mrb[20].mxu1  ;;  %v1016_v9 = vpop.f32.mrb[21].mxu0 }
 0x1cd   :  { %1534 = vst.msk [vmem:[#allocation5 + $0x68] sm:$0xff] %vm1520_vm1, %v1846_v8  ;;  %1529 = vst.msk [vmem:[#allocation5 + $0x40] sm:$0xff] %vm1520_vm1, %v1016_v9  ;;  %v1113_v10 = vpop.f32.mrb[21].mxu1 }
 0x1ce   :  { %1533 = vst.msk [vmem:[#allocation5 + $0x60] sm:$0xff] %vm1520_vm1, %v1113_v10 }
 0x1cf   :  { %v1839_v11 = vpop.f32.mrb[22].mxu0 }
 0x1d0   :  { %1532 = vst.msk [vmem:[#allocation5 + $0x58] sm:$0xff] %vm1520_vm1, %v1839_v11  ;;  %v1849_v12 = vpop.f32.mrb[22].mxu1  ;;  %v1026_v13 = vpop.f32.mrb[23].mxu0 }
 0x1d1   :  { %1536 = vst.msk [vmem:[#allocation5 + $0x78] sm:$0xff] %vm1520_vm1, %v1849_v12  ;;  %1531 = vst.msk [vmem:[#allocation5 + $0x50] sm:$0xff] %vm1520_vm1, %v1026_v13  ;;  %v1123_v14 = vpop.f32.mrb[23].mxu1 }
 0x1d2   :  { %1535 = vst.msk [vmem:[#allocation5 + $0x70] sm:$0xff] %vm1520_vm1, %v1123_v14 }
 0x1d3   :  { %v1856_v15 = vpop.f32.mrb[24].mxu0 }
 0x1d4   :  { %1538 = vst.msk [vmem:[#allocation5 + $0x88] sm:$0xff] %vm1520_vm1, %v1856_v15  ;;  %v1866_v16 = vpop.f32.mrb[24].mxu1  ;;  %v1210_v17 = vpop.f32.mrb[25].mxu0 }
 0x1d5   :  { %1542 = vst.msk [vmem:[#allocation5 + $0xa8] sm:$0xff] %vm1520_vm1, %v1866_v16  ;;  %1537 = vst.msk [vmem:[#allocation5 + $0x80] sm:$0xff] %vm1520_vm1, %v1210_v17  ;;  %v1307_v18 = vpop.f32.mrb[25].mxu1 }
 0x1d6   :  { %1541 = vst.msk [vmem:[#allocation5 + $0xa0] sm:$0xff] %vm1520_vm1, %v1307_v18 }
 0x1d7   :  { %v1859_v19 = vpop.f32.mrb[26].mxu0 }
 0x1d8   :  { %1540 = vst.msk [vmem:[#allocation5 + $0x98] sm:$0xff] %vm1520_vm1, %v1859_v19  ;;  %v1869_v20 = vpop.f32.mrb[26].mxu1  ;;  %v1220_v21 = vpop.f32.mrb[27].mxu0 }
 0x1d9   :  { %1544 = vst.msk [vmem:[#allocation5 + $0xb8] sm:$0xff] %vm1520_vm1, %v1869_v20  ;;  %1539 = vst.msk [vmem:[#allocation5 + $0x90] sm:$0xff] %vm1520_vm1, %v1220_v21  ;;  %v1317_v22 = vpop.f32.mrb[27].mxu1 }
 0x1da   :  { %1543 = vst.msk [vmem:[#allocation5 + $0xb0] sm:$0xff] %vm1520_vm1, %v1317_v22 }
 0x1db   :  { %v1876_v23 = vpop.f32.mrb[28].mxu0 }
 0x1dc   :  { %1546 = vst.msk [vmem:[#allocation5 + $0xc8] sm:$0xff] %vm1520_vm1, %v1876_v23  ;;  %v1886_v24 = vpop.f32.mrb[28].mxu1  ;;  %v1404_v25 = vpop.f32.mrb[29].mxu0 }
 0x1dd   :  { %1550 = vst.msk [vmem:[#allocation5 + $0xe8] sm:$0xff] %vm1520_vm1, %v1886_v24  ;;  %1545 = vst.msk [vmem:[#allocation5 + $0xc0] sm:$0xff] %vm1520_vm1, %v1404_v25  ;;  %v1501_v26 = vpop.f32.mrb[29].mxu1 }
 0x1de   :  { %1549 = vst.msk [vmem:[#allocation5 + $0xe0] sm:$0xff] %vm1520_vm1, %v1501_v26 }
 0x1df   :  { %v1879_v27 = vpop.f32.mrb[30].mxu0 }
 0x1e0   :  { %1548 = vst.msk [vmem:[#allocation5 + $0xd8] sm:$0xff] %vm1520_vm1, %v1879_v27  ;;  %v1889_v28 = vpop.f32.mrb[30].mxu1  ;;  %v1414_v29 = vpop.f32.mrb[31].mxu0 }
 0x1e1   :  { %1552 = vst.msk [vmem:[#allocation5 + $0xf8] sm:$0xff] %vm1520_vm1, %v1889_v28  ;;  %1547 = vst.msk [vmem:[#allocation5 + $0xd0] sm:$0xff] %vm1520_vm1, %v1414_v29  ;;  %v1511_v30 = vpop.f32.mrb[31].mxu1 }
 0x1e2   :  { %1551 = vst.msk [vmem:[#allocation5 + $0xf0] sm:$0xff] %vm1520_vm1, %v1511_v30 }
 0x1e3   :  { %1991 = shalt.err (!%p1988_p12)
}
 0x1e4   :  { %s1992_s13 = scalar_lea.hbm %s2215_s3, 4096 }
 0x1e5   :  { %p1993_p13 = scmp.ne.s32.totalorder %s2215_s3, %s1992_s13  ;;  %p1996_p0 = scmp.lt.u32.totalorder %s1992_s13, %s2215_s3 }
 0x1e7   :  { %p1998_p1 = pnand %p1996_p0, %p1993_p13 }
 0x1e9   :  { %2001 = shalt.err (!%p1998_p1)
}
 0x1ea   :  { %1564 = dma.vmem_to_hbm [thread:$0]  %s1559_s9, 4096, %s2215_s3, [#allocation4], %s2007_s22, %s2007_s22, %s2008_s23  }
 0x1eb   :  { %2004 = dma.done.wait [#allocation4], 4096  }
 0x1ec   :  { %2005 = vsyncadd [#allocation4], 4294963200 }
 0x1ed   :  { %1568 = vsyncpa [#allocation3], 1 }
 0x1ee   :  { %1569 = vsyncpa [#allocation4], 1 }

</bundles_post_ra>
